<compile_context>
chip_gen: v6e
topology: v6e:2x2x1
jax: 0.10.0
libtpu: 0.0.40
codegen_flags: <defaults>
</compile_context>

<pallas_src>
import jax
import jax.numpy as jnp
from jax.experimental import pallas as pl
from jax.experimental.pallas import tpu as pltpu


def _box_sdf_kernel(params_ref, pts_ref, out_ref):
    # params_ref: SMEM (6,) f32 = [cx, cy, cz, hx, hy, hz]
    # pts_ref:    VMEM (3, TR, 128) f32  (coordinate-planar points tile)
    # out_ref:    VMEM (TR, 128) f32
    cx = params_ref[0]
    cy = params_ref[1]
    cz = params_ref[2]
    hx = params_ref[3]
    hy = params_ref[4]
    hz = params_ref[5]

    dx = jnp.abs(pts_ref[0] - cx) - hx          # (TR, 128)
    dy = jnp.abs(pts_ref[1] - cy) - hy
    dz = jnp.abs(pts_ref[2] - cz) - hz

    # outside distance: ||max(diff, 0)||_2  — pure VPU + one EUP sqrt
    px = jnp.maximum(dx, 0.0)
    py = jnp.maximum(dy, 0.0)
    pz = jnp.maximum(dz, 0.0)
    outside = jnp.sqrt(px * px + py * py + pz * pz)

    # inside distance: min(max_j diff_j, 0) — elementwise 3-way max
    inside = jnp.minimum(jnp.maximum(dx, jnp.maximum(dy, dz)), 0.0)

    out_ref[...] = outside + inside


def box_sdf(points, center, side_lengths, *, tile_rows=1024):
    """points: any shape (..., 3); returns (N, 1) f32, N = prod(leading dims)."""
    lanes = 128

    pts_flat = points.reshape(-1, 3).astype(jnp.float32)   # == points.view(-1, 3)
    n = pts_flat.shape[0]

    # rows of 128 points each; rows padded to a multiple of the tile (>= 8
    # so the (8, 128) block rule holds for partial-sized tiles too).
    r = pl.cdiv(n, lanes)
    tr = min(tile_rows, pl.cdiv(r, 8) * 8)
    r_pad = pl.cdiv(r, tr) * tr
    n_pad = r_pad * lanes

    if n_pad != n:   # only pad when actually needed (avoid an extra HBM pass)
        pts_flat = jnp.pad(pts_flat, ((0, n_pad - n), (0, 0)))

    # coordinate-planar layout: (3, R, 128); point i -> (row=i//128, lane=i%128)
    # TODO(synk): this one-time transpose could be fused into the upstream producer.
    pts_planar = pts_flat.T.reshape(3, r_pad, lanes)

    # [cx, cy, cz, hx, hy, hz] as SMEM scalars (scalar prefetch)
    params = jnp.concatenate(
        [center.reshape(3).astype(jnp.float32),
         side_lengths.reshape(3).astype(jnp.float32) / 2.0])

    grid = (r_pad // tr,)

    out = pl.pallas_call(
        _box_sdf_kernel,
        out_shape=jax.ShapeDtypeStruct((r_pad, lanes), jnp.float32),
        grid_spec=pltpu.PrefetchScalarGridSpec(
            num_scalar_prefetch=1,
            grid=grid,
            in_specs=[
                # points tile, coordinate-planar, fully lane-dense
                pl.BlockSpec((3, tr, lanes), lambda i, params: (0, i, 0)),
            ],
            out_specs=pl.BlockSpec((tr, lanes), lambda i, params: (i, 0)),
        ),
        compiler_params=pltpu.CompilerParams(
            dimension_semantics=("parallel",),
        ),
    )(params, pts_planar)

    # back to (N, 1)
    return out.reshape(-1)[:n][:, None]


def box_sdf_ref(points, center, side_lengths):
    """Pure-JAX reference mirroring the PyTorch forward."""
    pts = points.reshape(-1, 3).astype(jnp.float32)
    diff = jnp.abs(pts - center.reshape(1, 3)) - side_lengths.reshape(1, 3) / 2.0
    outside = jnp.linalg.norm(jnp.maximum(diff, 0.0), axis=-1)
    inside = jnp.minimum(jnp.max(diff, axis=-1), 0.0)
    return (outside + inside)[..., None]


if __name__ == "__main__":
    key = jax.random.PRNGKey(0)

    # Deterministic "cfg" parameters (BoxSDF.__init__: center (1,3), side_lengths (1,3)).
    center = jnp.array([[0.1, -0.2, 0.3]], dtype=jnp.float32)
    side_lengths = jnp.array([[1.0, 0.5, 2.0]], dtype=jnp.float32)

    # Small point cloud; forward flattens it to (-1, 3).
    points = jax.random.normal(key, (2, 8, 16, 3), dtype=jnp.float32)

    out = box_sdf(points, center, side_lengths)
    out = jax.block_until_ready(out)

    ref = box_sdf_ref(points, center, side_lengths)
    assert out.shape == (2 * 8 * 16, 1), out.shape
    assert jnp.allclose(out, ref, atol=1e-5, rtol=1e-5), float(jnp.max(jnp.abs(out - ref)))

    print("KERNEL_OK")
</pallas_src>

<mosaic_0001>
module attributes {stable_mosaic.version = 11 : i64} {
  func.func @_box_sdf_kernel(%arg0: i32, %arg1: memref<6xf32, #tpu.memory_space<smem>>, %arg2: memref<3x8x128xf32, #tpu.memory_space<vmem>>, %arg3: memref<8x128xf32, #tpu.memory_space<vmem>>) attributes {dimension_semantics = [#tpu.dimension_semantics<parallel>], iteration_bounds = array<i64: 1>, scalar_prefetch = 1 : i64, scratch_operands = 0 : i64, tpu.core_type = #tpu.core_type<tc>, window_params = [{transform_indices = @transform_0, window_bounds = array<i64: 3, 8, 128>}, {transform_indices = @transform_1, window_bounds = array<i64: 8, 128>}]} {
    %c0 = arith.constant 0 : index
    %0 = memref.load %arg1[%c0] : memref<6xf32, #tpu.memory_space<smem>>
    %c1 = arith.constant 1 : index
    %1 = memref.load %arg1[%c1] : memref<6xf32, #tpu.memory_space<smem>>
    %c2 = arith.constant 2 : index
    %2 = memref.load %arg1[%c2] : memref<6xf32, #tpu.memory_space<smem>>
    %c3 = arith.constant 3 : index
    %3 = memref.load %arg1[%c3] : memref<6xf32, #tpu.memory_space<smem>>
    %c4 = arith.constant 4 : index
    %4 = memref.load %arg1[%c4] : memref<6xf32, #tpu.memory_space<smem>>
    %c5 = arith.constant 5 : index
    %5 = memref.load %arg1[%c5] : memref<6xf32, #tpu.memory_space<smem>>
    %c0_0 = arith.constant 0 : index
    %c0_1 = arith.constant 0 : index
    %c0_2 = arith.constant 0 : index
    %6 = vector.load %arg2[%c0_0, %c0_1, %c0_2] : memref<3x8x128xf32, #tpu.memory_space<vmem>>, vector<1x8x128xf32>
    %7 = vector.shape_cast %6 : vector<1x8x128xf32> to vector<8x128xf32>
    %8 = vector.broadcast %0 : f32 to vector<8x128xf32>
    %9 = arith.subf %7, %8 : vector<8x128xf32>
    %10 = math.absf %9 : vector<8x128xf32>
    %11 = vector.broadcast %3 : f32 to vector<8x128xf32>
    %12 = arith.subf %10, %11 : vector<8x128xf32>
    %c1_3 = arith.constant 1 : index
    %c0_4 = arith.constant 0 : index
    %c0_5 = arith.constant 0 : index
    %13 = vector.load %arg2[%c1_3, %c0_4, %c0_5] : memref<3x8x128xf32, #tpu.memory_space<vmem>>, vector<1x8x128xf32>
    %14 = vector.shape_cast %13 : vector<1x8x128xf32> to vector<8x128xf32>
    %15 = vector.broadcast %1 : f32 to vector<8x128xf32>
    %16 = arith.subf %14, %15 : vector<8x128xf32>
    %17 = math.absf %16 : vector<8x128xf32>
    %18 = vector.broadcast %4 : f32 to vector<8x128xf32>
    %19 = arith.subf %17, %18 : vector<8x128xf32>
    %c2_6 = arith.constant 2 : index
    %c0_7 = arith.constant 0 : index
    %c0_8 = arith.constant 0 : index
    %20 = vector.load %arg2[%c2_6, %c0_7, %c0_8] : memref<3x8x128xf32, #tpu.memory_space<vmem>>, vector<1x8x128xf32>
    %21 = vector.shape_cast %20 : vector<1x8x128xf32> to vector<8x128xf32>
    %22 = vector.broadcast %2 : f32 to vector<8x128xf32>
    %23 = arith.subf %21, %22 : vector<8x128xf32>
    %24 = math.absf %23 : vector<8x128xf32>
    %25 = vector.broadcast %5 : f32 to vector<8x128xf32>
    %26 = arith.subf %24, %25 : vector<8x128xf32>
    %cst = arith.constant 0.000000e+00 : f32
    %27 = vector.broadcast %cst : f32 to vector<8x128xf32>
    %28 = arith.maximumf %12, %27 : vector<8x128xf32>
    %cst_9 = arith.constant 0.000000e+00 : f32
    %29 = vector.broadcast %cst_9 : f32 to vector<8x128xf32>
    %30 = arith.maximumf %19, %29 : vector<8x128xf32>
    %cst_10 = arith.constant 0.000000e+00 : f32
    %31 = vector.broadcast %cst_10 : f32 to vector<8x128xf32>
    %32 = arith.maximumf %26, %31 : vector<8x128xf32>
    %33 = arith.mulf %28, %28 : vector<8x128xf32>
    %34 = arith.mulf %30, %30 : vector<8x128xf32>
    %35 = arith.addf %33, %34 : vector<8x128xf32>
    %36 = arith.mulf %32, %32 : vector<8x128xf32>
    %37 = arith.addf %35, %36 : vector<8x128xf32>
    %38 = math.sqrt %37 : vector<8x128xf32>
    %39 = arith.maximumf %19, %26 : vector<8x128xf32>
    %40 = arith.maximumf %12, %39 : vector<8x128xf32>
    %cst_11 = arith.constant 0.000000e+00 : f32
    %41 = vector.broadcast %cst_11 : f32 to vector<8x128xf32>
    %42 = arith.minimumf %40, %41 : vector<8x128xf32>
    %43 = arith.addf %38, %42 : vector<8x128xf32>
    %c0_12 = arith.constant 0 : index
    %c0_13 = arith.constant 0 : index
    %44 = vector.load %arg3[%c0_12, %c0_13] : memref<8x128xf32, #tpu.memory_space<vmem>>, vector<8x128xf32>
    tpu.vector_store %arg3[%c0_12, %c0_13], %43 {strides = array<i32>} : memref<8x128xf32, #tpu.memory_space<vmem>>, vector<8x128xf32>,
    return
  }
  func.func @transform_0(%arg0: i32, %arg1: memref<6xf32, #tpu.memory_space<smem>>) -> (i32, i32, i32) {
    %c0_i32 = arith.constant 0 : i32
    %c0_i32_0 = arith.constant 0 : i32
    %c0_i32_1 = arith.constant 0 : i32
    return %c0_i32, %arg0, %c0_i32_0 : i32, i32, i32
  }
  func.func @transform_1(%arg0: i32, %arg1: memref<6xf32, #tpu.memory_space<smem>>) -> (i32, i32) {
    %c0_i32 = arith.constant 0 : i32
    %c0_i32_0 = arith.constant 0 : i32
    return %arg0, %c0_i32 : i32, i32
  }
}

</mosaic_0001>

<bundles_post_ra>
// kernel: tpu_custom_call.1
= control target key start
LH: loop header
LB: loop body
LE: loop exit
PB: predicated region body
PF: predicated region fallthrough
CT: control target
= control target key end

     0   :  { %s155_s9 = smov [#allocation3]   ;;  %s184_s0 = inlined_call_operand.hbm [shape: f32[6], index: 0, kind: input, shape index: {}]   ;;  %s185_s1 = inlined_call_operand.hbm [shape: f32[3,8,128], index: 1, kind: input, shape index: {}]   ;;  %s186_s2 = inlined_call_operand.hbm [shape: f32[8,128], index: 2, kind: output, shape index: {}]  }
   0x1   :  { %8 = dma.hbm_to_smem %s184_s0, 16, %s155_s9, [#allocation2] }
   0x2   :  { %149 = dma.done.wait [#allocation2], 16 }
   0x3   :  { %150 = vsyncadd [#allocation2], 4294967280 }
   0x4   :  { %10 = sfence }
   0x5   :  { %11 = vsyncpa [#allocation5], 0 }
   0x6   :  { %12 = vsyncpa [#allocation6], 0  ;;  %s156_s12 = smov [#allocation4]  }
   0x7   :  { %s18_s13 = sshll.u32 %s156_s12, 4  ;;  %s19_s13 = int_to_ptr.vmem [resolvable:$true] %s18_s13 }
   0x8   :  { %s117_s14 = scalar_lea.vmem %s19_s13, 384  ;;  %p122_p1 = scmp.lt.s32.totalorder %s19_s13, %s19_s13 }
   0x9   :  { %p118_p0 = scmp.ne.s32.totalorder %s19_s13, %s117_s14  ;;  %p123_p2 = scmp.lt.s32.totalorder %s117_s14, %s117_s14 }
   0xb   :  { %p124_p3 = por %p123_p2, %p122_p1 }
   0xd   :  { %p125_p4 = pnand %p124_p3, %p118_p0 }
   0xf   :  { %128 = shalt.err (!%p125_p4)
}
  0x10   :  { %s157_s15 = smov 128   ;;  %s158_s16 = smov 8  }
  0x11   :  { %24 = dma.hbm_to_vmem [thread:$0]  %s185_s1, 384, %s19_s13, [#allocation5], %s157_s15, %s157_s15, %s158_s16  }
  0x12   :  { %151 = dma.done.wait [#allocation5], 384  }
  0x13   :  { %152 = vsyncadd [#allocation5], 4294966912  ;;  %s28_s0 = sld [smem:[#allocation3]]  ;;  %v34_v0 = vld [vmem:[#allocation4] sm:$0xff]  ;;  %v41_v2 = vld [vmem:[#allocation4 + $0x8] sm:$0xff]  ;;  %s159_s1 = smov [#allocation7]  }
  0x14   :  { %s89_s19 = sld [smem:[#allocation3 + $0x1]]  ;;  %v48_v3 = vld [vmem:[#allocation4 + $0x10] sm:$0xff]  ;;  %s80_s24 = sshll.u32 %s159_s1, 4  ;;  %s81_s24 = int_to_ptr.vmem [resolvable:$true] %s80_s24 }
  0x15   :  { %s90_s20 = sld [smem:[#allocation3 + $0x2]]  ;;  %s129_s25 = scalar_lea.vmem %s81_s24, 128 }
  0x16   :  { %s91_s21 = sld [smem:[#allocation3 + $0x3]]  ;;  %p130_p5 = scmp.ne.s32.totalorder %s81_s24, %s129_s25 }
  0x17   :  { %s92_s22 = sld [smem:[#allocation3 + $0x4]]  ;;  %p134_p6 = scmp.lt.s32.totalorder %s81_s24, %s81_s24 }
  0x18   :  { %s93_s23 = sld [smem:[#allocation3 + $0x5]]  ;;  %p135_p7 = scmp.lt.s32.totalorder %s129_s25, %s129_s25 }
  0x19   :  { %v35_v1 = vstv %s28_s0 }
  0x1a   :  { %v36_v4 = vsub.f32 %v34_v0, %v35_v1  ;;  %v42_v5 = vstv %s89_s19  ;;  %p136_p8 = por %p135_p7, %p134_p6 }
  0x1b   :  { %v43_v6 = vsub.f32 %v41_v2, %v42_v5  ;;  %v49_v7 = vstv %s90_s20 }
  0x1c   :  { %v37_v8 = vand.u32 2147483647, %v36_v4  ;;  %v38_v9 = vstv %s91_s21  ;;  %v50_v10 = vsub.f32 %v48_v3, %v49_v7  ;;  %p137_p9 = pnand %p136_p8, %p130_p5 }
  0x1d   :  { %v44_v11 = vand.u32 2147483647, %v43_v6  ;;  %v45_v12 = vstv %s92_s22 }
  0x1e   :  { %v39_v13 = vsub.f32 %v37_v8, %v38_v9  ;;  %v51_v14 = vand.u32 2147483647, %v50_v10  ;;  %v52_v15 = vstv %s93_s23 }
  0x1f   :  { %v46_v16 = vsub.f32 %v44_v11, %v45_v12 }
  0x20   :  { %v53_v17 = vsub.f32 %v51_v14, %v52_v15  ;;  %v54_v18 = vmax.f32 %v39_v13, 0.0 }
  0x21   :  { %v55_v19 = vmax.f32 %v46_v16, 0.0 }
  0x22   :  { %v56_v20 = vmax.f32 %v53_v17, 0.0  ;;  %v57_v21 = vmul.f32 %v54_v18, %v54_v18  ;;  %v69_v26 = vmax.f32 %v46_v16, %v53_v17 }
  0x23   :  { %v58_v22 = vmul.f32 %v55_v19, %v55_v19 }
  0x24   :  { %v60_v23 = vmul.f32 %v56_v20, %v56_v20  ;;  %v70_v27 = vmax.f32 %v39_v13, %v69_v26 }
  0x25   :  { %v59_v24 = vadd.f32 %v58_v22, %v57_v21 }
  0x26   :  { %v71_v31 = vmin.f32 %v70_v27, 0.0 }
  0x27   :  { %v61_v25 = vadd.f32 %v60_v23, %v59_v24 }
  0x29   :  { %99 = vrsqrt.f32 %v61_v25  ;;  %vm64_vm0 = vcmp.eq.f32.partialorder %v61_v25, inf  ;;  %v67_v29 = vand.u32 2147483648, %v61_v25  ;;  %vm66_vm1 = vcmp.eq.f32.partialorder %v61_v25, 0.0 }
  0x36   :  { %v100_v28 = vpop.eup %99 }
  0x37   :  { %v63_v30 = vmul.f32 %v100_v28, %v61_v25 }
  0x39   :  { %v65_v32 = vsel %vm64_vm0, %v61_v25, %v63_v30 }
  0x3a   :  { %v68_v33 = vsel %vm66_vm1, %v67_v29, %v65_v32 }
  0x3b   :  { %v72_v34 = vadd.f32 %v71_v31, %v68_v33 }
  0x3d   :  { %73 = vst [vmem:[#allocation7] sm:$0xff] %v72_v34 }
  0x3e   :  { %140 = shalt.err (!%p137_p9)
}
  0x3f   :  { %83 = dma.vmem_to_hbm [thread:$0]  %s81_s24, 128, %s186_s2, [#allocation6]  }
  0x40   :  { %153 = dma.done.wait [#allocation6], 128  }
  0x41   :  { %154 = vsyncadd [#allocation6], 4294967168 }
  0x42   :  { %87 = vsyncpa [#allocation5], 1 }
  0x43   :  { %88 = vsyncpa [#allocation6], 1 }

</bundles_post_ra>
